<compile_context>
chip_gen: v5e
topology: v5e:2x2
jax: 0.10.0
libtpu: 0.0.40
codegen_flags: <defaults>
</compile_context>

<pallas_src>
import jax
import jax.numpy as jnp
from jax.experimental import pallas as pl
from jax.experimental.pallas import tpu as pltpu

_SUBLANE = 8  # second-to-last dim granularity


def _round_up(x, m):
    return ((x + m - 1) // m) * m


def actor_kernel(x_ref, w1_ref, b1_ref, w2_ref, b2_ref, w3_ref, b3_ref, o_ref):
    # Layer 1: Linear + ReLU  (MXU matmul, f32 accumulate, VPU max)
    h = jnp.dot(x_ref[...], w1_ref[...], preferred_element_type=jnp.float32)
    h = jnp.maximum(h + b1_ref[...], 0.0)
    # Layer 2: Linear + ReLU
    h = jnp.dot(h, w2_ref[...], preferred_element_type=jnp.float32)
    h = jnp.maximum(h + b2_ref[...], 0.0)
    # Layer 3: Linear + tanh (tanh runs on the EUP)
    h = jnp.dot(h, w3_ref[...], preferred_element_type=jnp.float32)
    o_ref[...] = jnp.tanh(h + b3_ref[...]).astype(o_ref.dtype)


def actor_forward(x, params, *, max_batch_tile=2048):
    """x: (batch, obs_dim) f32. params: dict of w1,b1,w2,b2,w3,b3.

    Weights are stored transposed vs. nn.Linear: w has shape
    (in_features, out_features), biases are (1, out_features).
    Best MXU/layout behaviour when hidden_1/hidden_2 are multiples of 128
    (the default 128/128 is ideal); other sizes are still correct.
    """
    w1, b1 = params["w1"], params["b1"]
    w2, b2 = params["w2"], params["b2"]
    w3, b3 = params["w3"], params["b3"]

    batch, obs_dim = x.shape
    hidden_1 = w1.shape[1]
    hidden_2 = w2.shape[1]
    action_dim = w3.shape[1]

    # Pad the batch only up to a sublane multiple so the row block size is
    # legal.  Feature dims stay unpadded (full-dim blocks below 128 lanes are
    # legal; VMEM-internal padding is free).
    batch_pad = _round_up(batch, _SUBLANE)
    x_in = x if batch_pad == batch else jnp.pad(x, ((0, batch_pad - batch), (0, 0)))

    # Batch tile: large (amortizes per-grid-step overhead), sublane-aligned,
    # and -- when more than one step -- chosen so the step count is even so
    # v7x's two TensorCores split the "parallel" axis evenly.
    tb = _round_up(min(max_batch_tile, batch_pad), _SUBLANE)
    n_steps = pl.cdiv(batch_pad, tb)
    if n_steps > 1 and n_steps % 2 == 1:
        tb = _round_up(pl.cdiv(batch_pad, n_steps + 1), _SUBLANE)
        n_steps = pl.cdiv(batch_pad, tb)

    def const_map(i):  # weights / biases: same block every step -> VMEM-resident
        return (0, 0)

    flops = 2 * batch_pad * (obs_dim * hidden_1
                             + hidden_1 * hidden_2
                             + hidden_2 * action_dim)
    bytes_accessed = 4 * (x_in.size + w1.size + b1.size + w2.size + b2.size
                          + w3.size + b3.size + batch_pad * action_dim)

    out_padded = pl.pallas_call(
        actor_kernel,
        out_shape=jax.ShapeDtypeStruct((batch_pad, action_dim), jnp.float32),
        grid=(n_steps,),
        in_specs=[
            pl.BlockSpec((tb, obs_dim), lambda i: (i, 0)),      # x (streamed)
            pl.BlockSpec((obs_dim, hidden_1), const_map),       # w1 (resident)
            pl.BlockSpec((1, hidden_1), const_map),             # b1
            pl.BlockSpec((hidden_1, hidden_2), const_map),      # w2
            pl.BlockSpec((1, hidden_2), const_map),             # b2
            pl.BlockSpec((hidden_2, action_dim), const_map),    # w3
            pl.BlockSpec((1, action_dim), const_map),           # b3
        ],
        out_specs=pl.BlockSpec((tb, action_dim), lambda i: (i, 0)),
        compiler_params=pltpu.CompilerParams(
            dimension_semantics=("parallel",),  # shard batch across v7x's 2 TCs
        ),
        cost_estimate=pl.CostEstimate(
            flops=int(flops),
            transcendentals=int(batch * action_dim),
            bytes_accessed=int(bytes_accessed),
        ),
    )(x_in, w1, b1, w2, b2, w3, b3)

    return out_padded[:batch]


def init_actor_params(key, obs_dim, action_dim, hidden_1=128, hidden_2=128):
    """Deterministic PyTorch-style (uniform +/- 1/sqrt(fan_in)) init."""
    ks = jax.random.split(key, 6)

    def linear(kw, kb, fan_in, fan_out):
        bound = 1.0 / jnp.sqrt(jnp.float32(fan_in))
        w = jax.random.uniform(kw, (fan_in, fan_out), jnp.float32, -bound, bound)
        b = jax.random.uniform(kb, (1, fan_out), jnp.float32, -bound, bound)
        return w, b

    w1, b1 = linear(ks[0], ks[1], obs_dim, hidden_1)
    w2, b2 = linear(ks[2], ks[3], hidden_1, hidden_2)
    w3, b3 = linear(ks[4], ks[5], hidden_2, action_dim)
    return {"w1": w1, "b1": b1, "w2": w2, "b2": b2, "w3": w3, "b3": b3}


def actor_forward_ref(x, p):
    """Pure-JAX reference for correctness check."""
    h = jnp.maximum(x @ p["w1"] + p["b1"], 0.0)
    h = jnp.maximum(h @ p["w2"] + p["b2"], 0.0)
    return jnp.tanh(h @ p["w3"] + p["b3"])


if __name__ == "__main__":
    key = jax.random.PRNGKey(0)
    k_param, k_x = jax.random.split(key)

    batch, obs_dim, action_dim = 8, 16, 8
    hidden_1, hidden_2 = 128, 128

    params = init_actor_params(k_param, obs_dim, action_dim, hidden_1, hidden_2)
    x = jax.random.normal(k_x, (batch, obs_dim), jnp.float32)

    out = jax.block_until_ready(actor_forward(x, params))
    ref = actor_forward_ref(x, params)
    assert out.shape == (batch, action_dim)
    assert jnp.allclose(out, ref, atol=1e-5, rtol=1e-5), "mismatch vs JAX reference"

    # Larger batch, single tile (exercises batch padding to a sublane multiple).
    x_big = jax.random.normal(jax.random.PRNGKey(1), (1030, obs_dim), jnp.float32)
    out_big = jax.block_until_ready(actor_forward(x_big, params))
    ref_big = actor_forward_ref(x_big, params)
    assert out_big.shape == (1030, action_dim)
    assert jnp.allclose(out_big, ref_big, atol=1e-5, rtol=1e-5), "mismatch (big)"

    # Forced multi-step grid (exercises streaming, ragged last block, and the
    # even-grid tile adjustment).
    out_tiled = jax.block_until_ready(actor_forward(x_big, params, max_batch_tile=256))
    assert out_tiled.shape == (1030, action_dim)
    assert jnp.allclose(out_tiled, ref_big, atol=1e-5, rtol=1e-5), "mismatch (tiled)"

    print("KERNEL_OK")
</pallas_src>

<mosaic_0001>
module attributes {stable_mosaic.version = 11 : i64} {
  func.func @actor_kernel(%arg0: i32, %arg1: memref<8x16xf32, #tpu.memory_space<vmem>>, %arg2: memref<16x128xf32, #tpu.memory_space<vmem>>, %arg3: memref<1x128xf32, #tpu.memory_space<vmem>>, %arg4: memref<128x128xf32, #tpu.memory_space<vmem>>, %arg5: memref<1x128xf32, #tpu.memory_space<vmem>>, %arg6: memref<128x8xf32, #tpu.memory_space<vmem>>, %arg7: memref<1x8xf32, #tpu.memory_space<vmem>>, %arg8: memref<8x8xf32, #tpu.memory_space<vmem>>) attributes {dimension_semantics = [#tpu.dimension_semantics<parallel>], iteration_bounds = array<i64: 1>, scalar_prefetch = 0 : i64, scratch_operands = 0 : i64, tpu.core_type = #tpu.core_type<tc>, window_params = [{transform_indices = @transform_0, window_bounds = array<i64: 8, 16>}, {pipeline_mode = #tpu.pipeline_mode<synchronous>, transform_indices = @transform_1, window_bounds = array<i64: 16, 128>}, {pipeline_mode = #tpu.pipeline_mode<synchronous>, transform_indices = @transform_2, window_bounds = array<i64: 1, 128>}, {pipeline_mode = #tpu.pipeline_mode<synchronous>, transform_indices = @transform_3, window_bounds = array<i64: 128, 128>}, {pipeline_mode = #tpu.pipeline_mode<synchronous>, transform_indices = @transform_4, window_bounds = array<i64: 1, 128>}, {pipeline_mode = #tpu.pipeline_mode<synchronous>, transform_indices = @transform_5, window_bounds = array<i64: 128, 8>}, {pipeline_mode = #tpu.pipeline_mode<synchronous>, transform_indices = @transform_6, window_bounds = array<i64: 1, 8>}, {transform_indices = @transform_7, window_bounds = array<i64: 8, 8>}]} {
    %c0 = arith.constant 0 : index
    %c0_0 = arith.constant 0 : index
    %0 = vector.load %arg1[%c0, %c0_0] : memref<8x16xf32, #tpu.memory_space<vmem>>, vector<8x16xf32>
    %c0_1 = arith.constant 0 : index
    %c0_2 = arith.constant 0 : index
    %1 = vector.load %arg2[%c0_1, %c0_2] : memref<16x128xf32, #tpu.memory_space<vmem>>, vector<16x128xf32>
    %cst = arith.constant dense<0.000000e+00> : vector<8x128xf32>
    %2 = tpu.matmul %0, %1, %cst {dimension_numbers = #tpu.dot_dimension_numbers<[1], [0], [0], [1], [0, 0, 1, 1], [], []>} : vector<8x16xf32>, vector<16x128xf32>, vector<8x128xf32> -> vector<8x128xf32>
    %c0_3 = arith.constant 0 : index
    %c0_4 = arith.constant 0 : index
    %3 = vector.load %arg3[%c0_3, %c0_4] : memref<1x128xf32, #tpu.memory_space<vmem>>, vector<1x128xf32>
    %4 = vector.broadcast %3 : vector<1x128xf32> to vector<8x128xf32>
    %5 = arith.addf %2, %4 : vector<8x128xf32>
    %cst_5 = arith.constant 0.000000e+00 : f32
    %6 = vector.broadcast %cst_5 : f32 to vector<8x128xf32>
    %7 = arith.maximumf %5, %6 : vector<8x128xf32>
    %c0_6 = arith.constant 0 : index
    %c0_7 = arith.constant 0 : index
    %8 = vector.load %arg4[%c0_6, %c0_7] : memref<128x128xf32, #tpu.memory_space<vmem>>, vector<128x128xf32>
    %cst_8 = arith.constant dense<0.000000e+00> : vector<8x128xf32>
    %9 = tpu.matmul %7, %8, %cst_8 {dimension_numbers = #tpu.dot_dimension_numbers<[1], [0], [0], [1], [0, 0, 1, 1], [], []>} : vector<8x128xf32>, vector<128x128xf32>, vector<8x128xf32> -> vector<8x128xf32>
    %c0_9 = arith.constant 0 : index
    %c0_10 = arith.constant 0 : index
    %10 = vector.load %arg5[%c0_9, %c0_10] : memref<1x128xf32, #tpu.memory_space<vmem>>, vector<1x128xf32>
    %11 = vector.broadcast %10 : vector<1x128xf32> to vector<8x128xf32>
    %12 = arith.addf %9, %11 : vector<8x128xf32>
    %cst_11 = arith.constant 0.000000e+00 : f32
    %13 = vector.broadcast %cst_11 : f32 to vector<8x128xf32>
    %14 = arith.maximumf %12, %13 : vector<8x128xf32>
    %c0_12 = arith.constant 0 : index
    %c0_13 = arith.constant 0 : index
    %15 = vector.load %arg6[%c0_12, %c0_13] : memref<128x8xf32, #tpu.memory_space<vmem>>, vector<128x8xf32>
    %cst_14 = arith.constant dense<0.000000e+00> : vector<8x8xf32>
    %16 = tpu.matmul %14, %15, %cst_14 {dimension_numbers = #tpu.dot_dimension_numbers<[1], [0], [0], [1], [0, 0, 1, 1], [], []>} : vector<8x128xf32>, vector<128x8xf32>, vector<8x8xf32> -> vector<8x8xf32>
    %c0_15 = arith.constant 0 : index
    %c0_16 = arith.constant 0 : index
    %17 = vector.load %arg7[%c0_15, %c0_16] : memref<1x8xf32, #tpu.memory_space<vmem>>, vector<1x8xf32>
    %18 = vector.broadcast %17 : vector<1x8xf32> to vector<8x8xf32>
    %19 = arith.addf %16, %18 : vector<8x8xf32>
    %20 = math.tanh %19 : vector<8x8xf32>
    %c0_17 = arith.constant 0 : index
    %c0_18 = arith.constant 0 : index
    %21 = vector.load %arg8[%c0_17, %c0_18] : memref<8x8xf32, #tpu.memory_space<vmem>>, vector<8x8xf32>
    tpu.vector_store %arg8[%c0_17, %c0_18], %20 {strides = array<i32>} : memref<8x8xf32, #tpu.memory_space<vmem>>, vector<8x8xf32>,
    return
  }
  func.func @transform_0(%arg0: i32) -> (i32, i32) {
    %c0_i32 = arith.constant 0 : i32
    %c0_i32_0 = arith.constant 0 : i32
    return %arg0, %c0_i32 : i32, i32
  }
  func.func @transform_1(%arg0: i32) -> (i32, i32) {
    %c0_i32 = arith.constant 0 : i32
    %c0_i32_0 = arith.constant 0 : i32
    %c0_i32_1 = arith.constant 0 : i32
    return %c0_i32, %c0_i32_0 : i32, i32
  }
  func.func @transform_2(%arg0: i32) -> (i32, i32) {
    %c0_i32 = arith.constant 0 : i32
    %c0_i32_0 = arith.constant 0 : i32
    %c0_i32_1 = arith.constant 0 : i32
    return %c0_i32, %c0_i32_0 : i32, i32
  }
  func.func @transform_3(%arg0: i32) -> (i32, i32) {
    %c0_i32 = arith.constant 0 : i32
    %c0_i32_0 = arith.constant 0 : i32
    %c0_i32_1 = arith.constant 0 : i32
    return %c0_i32, %c0_i32_0 : i32, i32
  }
  func.func @transform_4(%arg0: i32) -> (i32, i32) {
    %c0_i32 = arith.constant 0 : i32
    %c0_i32_0 = arith.constant 0 : i32
    %c0_i32_1 = arith.constant 0 : i32
    return %c0_i32, %c0_i32_0 : i32, i32
  }
  func.func @transform_5(%arg0: i32) -> (i32, i32) {
    %c0_i32 = arith.constant 0 : i32
    %c0_i32_0 = arith.constant 0 : i32
    %c0_i32_1 = arith.constant 0 : i32
    return %c0_i32, %c0_i32_0 : i32, i32
  }
  func.func @transform_6(%arg0: i32) -> (i32, i32) {
    %c0_i32 = arith.constant 0 : i32
    %c0_i32_0 = arith.constant 0 : i32
    %c0_i32_1 = arith.constant 0 : i32
    return %c0_i32, %c0_i32_0 : i32, i32
  }
  func.func @transform_7(%arg0: i32) -> (i32, i32) {
    %c0_i32 = arith.constant 0 : i32
    %c0_i32_0 = arith.constant 0 : i32
    return %arg0, %c0_i32 : i32, i32
  }
}

</mosaic_0001>

<bundles_post_ra>
// kernel: tpu_custom_call.1
= control target key start
LH: loop header
LB: loop body
LE: loop exit
PB: predicated region body
PF: predicated region fallthrough
CT: control target
= control target key end

     0   :  { %12 = vsyncpa [#allocation3], 0  ;;  %s396_s0 = inlined_call_operand.vmem [shape: f32[8,16], index: 0, kind: input, shape index: {}]   ;;  %s397_s1 = inlined_call_operand.hbm [shape: f32[16,128], index: 1, kind: input, shape index: {}]   ;;  %s398_s2 = inlined_call_operand.vmem [shape: f32[1,128], index: 2, kind: input, shape index: {}]   ;;  %s399_s3 = inlined_call_operand.vmem [shape: f32[128,128], index: 3, kind: input, shape index: {}]   ;;  %s400_s4 = inlined_call_operand.vmem [shape: f32[1,128], index: 4, kind: input, shape index: {}]   ;;  %s401_s5 = inlined_call_operand.vmem [shape: f32[128,8], index: 5, kind: input, shape index: {}]   ;;  %s402_s6 = inlined_call_operand.vmem [shape: f32[1,8], index: 6, kind: input, shape index: {}]   ;;  %s403_s7 = inlined_call_operand.hbm [shape: f32[8,8], index: 7, kind: output, shape index: {}]  }
   0x1   :  { %13 = vsyncpa [#allocation4], 0  ;;  %s20_s26 = sshll.u32 %s397_s1, 4  ;;  %s238_s27 = smov [#allocation2]   ;;  %s21_s26 = int_to_ptr.hbm [resolvable:$true] %s20_s26 }
   0x2   :  { %s22_s28 = sshll.u32 %s238_s27, 4  ;;  %s239_s29 = smov 128   ;;  %s23_s28 = int_to_ptr.vmem [resolvable:$true] %s22_s28 }
   0x3   :  { %s240_s30 = smov 8  }
   0x4   :  { %28 = dma.hbm_to_vmem [thread:$0]  %s21_s26, 256, %s23_s28, [#allocation3], %s239_s29, %s239_s29, %s240_s30  }
   0x5   :  { %234 = dma.done.wait [#allocation3], 256  }
   0x6   :  { %235 = vsyncadd [#allocation3], 4294967040  ;;  %v45_v0 = vld [vmem:[#allocation2 + $0x8] sm:$0xff]  ;;  %v44_v1 = vld [vmem:[#allocation2] sm:$0xff]  ;;  %vm50_vm0 = vcmask 130048   ;;  %s241_s25 = smov [#allocation5]  }
   0x7   :  { %68 = vmatpush.msra.mxu0 %v45_v0  ;;  %v43_v2 = vld [vmem:[%s396_s0] sm:$0xff]  ;;  %v90_v3 = vld [vmem:[%s399_s3 + $0x78] sm:$0xff]  ;;  %v89_v4 = vld [vmem:[%s399_s3 + $0x70] sm:$0xff]  ;;  %s164_s26 = sshll.u32 %s241_s25, 4  ;;  %s166_s28 = sshll.u32 %s403_s7, 4  ;;  %vm157_vm1 = vcmask 64512   ;;  %s165_s26 = int_to_ptr.vmem [resolvable:$true] %s164_s26  ;;  %s167_s28 = int_to_ptr.hbm [resolvable:$true] %s166_s28 }
   0x8   :  { %95 = vmatpush.msra.mxu1 %v90_v3  ;;  %v88_v5 = vld [vmem:[%s399_s3 + $0x68] sm:$0xff]  ;;  %v87_v6 = vld [vmem:[%s399_s3 + $0x60] sm:$0xff]  ;;  %v86_v7 = vld [vmem:[%s399_s3 + $0x58] sm:$0xff] }
   0x9   :  { %69 = vmatpush.msra.mxu0 %v44_v1  ;;  %v85_v8 = vld [vmem:[%s399_s3 + $0x50] sm:$0xff]  ;;  %v84_v9 = vld [vmem:[%s399_s3 + $0x48] sm:$0xff]  ;;  %v83_v10 = vld [vmem:[%s399_s3 + $0x40] sm:$0xff] }
   0xa   :  { %176 = vmatmul.msk.f32.vlgmr.msra.gmra.mxu0 %vm50_vm0, %v43_v2  ;;  %96 = vmatpush.msra.mxu1 %v89_v4  ;;  %v82_v11 = vld [vmem:[%s399_s3 + $0x38] sm:$0xff]  ;;  %v81_v12 = vld [vmem:[%s399_s3 + $0x30] sm:$0xff]  ;;  %v80_v13 = vld [vmem:[%s399_s3 + $0x28] sm:$0xff] }
   0xb   :  { %v79_v14 = vld [vmem:[%s399_s3 + $0x20] sm:$0xff]  ;;  %v78_v15 = vld [vmem:[%s399_s3 + $0x18] sm:$0xff]  ;;  %v77_v16 = vld [vmem:[%s399_s3 + $0x10] sm:$0xff] }
   0xc   :  { %97 = vmatpush.msra.mxu1 %v88_v5  ;;  %v76_v17 = vld [vmem:[%s399_s3 + $0x8] sm:$0xff]  ;;  %v75_v18 = vld [vmem:[%s399_s3] sm:$0xff]  ;;  %v131_v19 = vld [vmem:[%s401_s5 + $0x78] sm:$0xff] }
   0xd   :  { %v130_v20 = vld [vmem:[%s401_s5 + $0x70] sm:$0xff]  ;;  %136 = vmatpush.msra.mxu2 %v131_v19  ;;  %v129_v21 = vld [vmem:[%s401_s5 + $0x68] sm:$0xff]  ;;  %v128_v22 = vld [vmem:[%s401_s5 + $0x60] sm:$0xff] }
   0xe   :  { %98 = vmatpush.msra.mxu1 %v87_v6  ;;  %v127_v23 = vld [vmem:[%s401_s5 + $0x58] sm:$0xff]  ;;  %v126_v24 = vld [vmem:[%s401_s5 + $0x50] sm:$0xff]  ;;  %v125_v25 = vld [vmem:[%s401_s5 + $0x48] sm:$0xff] }
   0xf   :  { %137 = vmatpush.msra.mxu2 %v130_v20  ;;  %v124_v26 = vld [vmem:[%s401_s5 + $0x40] sm:$0xff]  ;;  %v123_v27 = vld [vmem:[%s401_s5 + $0x38] sm:$0xff]  ;;  %v122_v28 = vld [vmem:[%s401_s5 + $0x30] sm:$0xff] }
  0x10   :  { %99 = vmatpush.msra.mxu1 %v86_v7  ;;  %v121_v29 = vld [vmem:[%s401_s5 + $0x28] sm:$0xff]  ;;  %v120_v30 = vld [vmem:[%s401_s5 + $0x20] sm:$0xff]  ;;  %v119_v31 = vld [vmem:[%s401_s5 + $0x18] sm:$0xff] }
  0x11   :  { %138 = vmatpush.msra.mxu2 %v129_v21  ;;  %v181_v32 = vld [vmem:[%s398_s2] ss:$0 sm:$0xff]  ;;  %v118_v36 = vld [vmem:[%s401_s5 + $0x10] sm:$0xff]  ;;  %v117_v37 = vld [vmem:[%s401_s5 + $0x8] sm:$0xff] }
  0x12   :  { %100 = vmatpush.msra.mxu1 %v85_v8  ;;  %v116_v38 = vld [vmem:[%s401_s5] sm:$0xff] }
  0x13   :  { %139 = vmatpush.msra.mxu2 %v128_v22  ;;  %v182_v39 = vld [vmem:[%s400_s4] ss:$0 sm:$0xff] }
  0x14   :  { %101 = vmatpush.msra.mxu1 %v84_v9  ;;  %v183_v43 = vld [vmem:[%s402_s6] ss:$0 sm:$0xff] }
  0x15   :  { %140 = vmatpush.msra.mxu2 %v127_v23 }
  0x16   :  { %102 = vmatpush.msra.mxu1 %v83_v10 }
  0x17   :  { %141 = vmatpush.msra.mxu2 %v126_v24 }
  0x18   :  { %103 = vmatpush.msra.mxu1 %v82_v11 }
  0x19   :  { %142 = vmatpush.msra.mxu2 %v125_v25 }
  0x1a   :  { %104 = vmatpush.msra.mxu1 %v81_v12 }
  0x1b   :  { %143 = vmatpush.msra.mxu2 %v124_v26 }
  0x1c   :  { %105 = vmatpush.msra.mxu1 %v80_v13 }
  0x1d   :  { %144 = vmatpush.msra.mxu2 %v123_v27 }
  0x1e   :  { %106 = vmatpush.msra.mxu1 %v79_v14 }
  0x1f   :  { %145 = vmatpush.msra.mxu2 %v122_v28 }
  0x20   :  { %107 = vmatpush.msra.mxu1 %v78_v15 }
  0x21   :  { %146 = vmatpush.msra.mxu2 %v121_v29 }
  0x22   :  { %108 = vmatpush.msra.mxu1 %v77_v16 }
  0x23   :  { %147 = vmatpush.msra.mxu2 %v120_v30 }
  0x24   :  { %109 = vmatpush.msra.mxu1 %v76_v17 }
  0x25   :  { %148 = vmatpush.msra.mxu2 %v119_v31 }
  0x26   :  { %110 = vmatpush.msra.mxu1 %v75_v18 }
  0x27   :  { %149 = vmatpush.msra.mxu2 %v118_v36 }
  0x29   :  { %150 = vmatpush.msra.mxu2 %v117_v37 }
  0x2b   :  { %151 = vmatpush.msra.mxu2 %v116_v38 }
  0x87   :  { %v71_v33 = vpop.f32.mrf.mxu0 }
  0x88   :  { %v72_v34 = vadd.f32 %v181_v32, %v71_v33 }
  0x8a   :  { %v74_v35 = vmax.f32 %v72_v34, 0.0 }
  0x8c   :  { %111 = vmatmul.f32.vlgmr.msra.gmra.mxu1 %v74_v35 }
 0x109   :  { %v112_v40 = vpop.f32.mrf.mxu1 }
 0x10a   :  { %v113_v41 = vadd.f32 %v182_v39, %v112_v40 }
 0x10c   :  { %v115_v42 = vmax.f32 %v113_v41, 0.0 }
 0x10e   :  { %152 = vmatmul.f32.vlgmr.msra.gmra.mxu2 %v115_v42 }
 0x191   :  { %v153_v44 = vpop.f32.mrf.mxu2 }
 0x192   :  { %v154_v45 = vadd.f32 %v183_v43, %v153_v44 }
 0x194   :  { %184 = vtanh.f32 %v154_v45 }
 0x19a   :  { %v185_v46 = vpop.eup %184 }
 0x19b   :  { %158 = vst.msk [vmem:[#allocation5] sm:$0xff] %vm157_vm1, %v185_v46 }
 0x19c   :  { %169 = dma.vmem_to_hbm [thread:$0]  %s165_s26, 128, %s167_s28, [#allocation4]  }
 0x19d   :  { %236 = dma.done.wait [#allocation4], 128  }
 0x19e   :  { %237 = vsyncadd [#allocation4], 4294967168 }
 0x19f   :  { %174 = vsyncpa [#allocation3], 1 }
 0x1a0   :  { %175 = vsyncpa [#allocation4], 1 }

</bundles_post_ra>
